<compile_context>
chip_gen: v7x
topology: tpu7x:2x2x1
jax: 0.10.0
libtpu: 0.0.40
codegen_flags: <defaults>
</compile_context>

<pallas_src>
import jax
import jax.numpy as jnp
from jax.experimental import pallas as pl
from jax.experimental.pallas import tpu as pltpu


_LANE = 128


def _make_conv_stats_kernel(*, n_win, C_in, C_out, kH, kW, dil, pad, W, TS):
    """Fused depthwise(dilated)+pointwise conv; also emits per-sample sum/sumsq."""

    def kernel(*refs):
        x_wins = refs[:n_win]              # n_win x (1, 1, C_in, 128) aligned window rows
        dwk_ref = refs[n_win]              # (C_in, kH*kW) depthwise taps
        pwm_ref = refs[n_win + 1]          # (C_out, C_in)  pointwise weights
        z_ref = refs[n_win + 2]            # (1, C_out, TS) conv output tile
        stats_ref = refs[n_win + 3]        # (1, C_out, 2)  per-sample [sum, sumsq]

        t = pl.program_id(1)

        # (C_in, n_win*128) flat window covering output lanes [t*TS, t*TS + TS + off_max)
        window = jnp.concatenate([w[0, 0, :, :] for w in x_wins], axis=-1)
        dwk = dwk_ref[...]
        pwm = pwm_ref[...]

        # wo = (flat output index) mod W; zeroes taps that fall outside the (virtual)
        # W padding.  Identical for every tile because TS % W == 0.
        col = jax.lax.broadcasted_iota(jnp.int32, (1, TS), 1) % W

        # --- depthwise dilated conv on (C_in, TS) slabs (VPU) ---
        dw_out = jnp.zeros((C_in, TS), jnp.float32)
        for kw in range(kW):
            shift = kw * dil - pad                              # w_in = wo + shift
            valid = jnp.logical_and(col >= -shift, col < W - shift)
            part = jnp.zeros((C_in, TS), jnp.float32)
            for kh in range(kH):
                off = kh * dil * W + kw * dil                   # static lane offset
                tap = kh * kW + kw
                part = part + dwk[:, tap:tap + 1] * window[:, off:off + TS]
            dw_out = dw_out + jnp.where(valid, part, 0.0)

        # --- pointwise 1x1 conv: C_in rank-1 updates into the (C_out, TS) tile ---
        acc = jnp.zeros((C_out, TS), jnp.float32)
        for ci in range(C_in):
            acc = acc + pwm[:, ci:ci + 1] * dw_out[ci:ci + 1, :]

        z_ref[0] = acc                                          # lane-dense store

        s1 = jnp.sum(acc, axis=-1, keepdims=True)               # (C_out, 1)
        s2 = jnp.sum(acc * acc, axis=-1, keepdims=True)         # (C_out, 1)

        @pl.when(t == 0)
        def _init():
            stats_ref[0, :, 0:1] = s1
            stats_ref[0, :, 1:2] = s2

        @pl.when(t > 0)
        def _accumulate():
            stats_ref[0, :, 0:1] = stats_ref[0, :, 0:1] + s1
            stats_ref[0, :, 1:2] = stats_ref[0, :, 1:2] + s2

    return kernel


def _make_bn_act_kernel(*, inv_count, eps=1e-5):
    """Training-mode BatchNorm (batch stats, biased var) + PhotonicSigmoid."""
    # TODO(synk): BatchNorm running_mean/running_var buffers are not updated
    # (forward uses batch statistics, matching the PyTorch training-mode output).

    def kernel(z_ref, stats_ref, gamma_ref, beta_ref, o_ref):
        tot = jnp.sum(stats_ref[...], axis=0)                   # (C_out, 2) over samples
        mean = tot[:, 0:1] * inv_count                          # (C_out, 1)
        var = tot[:, 1:2] * inv_count - mean * mean             # biased variance
        scale = gamma_ref[...] * jax.lax.rsqrt(var + eps)       # (C_out, 1)
        shift = beta_ref[...] - mean * scale

        y = z_ref[0] * scale + shift                            # (C_out, TS)
        e = jnp.exp((y - 0.145) * (1.0 / 0.073))                # EUP
        o_ref[0] = 1.005 + (0.06 - 1.005) * pl.reciprocal(1.0 + e, approx=True)

    return kernel


def dilconv_forward(x_nchw, dw_weight, pw_weight, gamma, beta, *,
                    stride, padding, dilation):
    """x_nchw: (N, C_in, H, W).  Returns (N, C_out, Ho, Wo) float32."""
    N, C_in, H, W = x_nchw.shape
    kH, kW, _ = dw_weight.shape
    C_out = pw_weight.shape[1]
    d, p = dilation, padding

    Ho = (H + 2 * p - d * (kH - 1) - 1) // stride + 1
    Wo = (W + 2 * p - d * (kW - 1) - 1) // stride + 1

    # TODO(synk): stride > 1 / non-"same" W padding need a strided-gather tap path;
    # the flat-lane formulation below requires stride == 1 and Wo == W.
    if stride != 1 or Wo != W:
        raise NotImplementedError(
            "Pallas DilConv kernel requires stride=1 and 2*padding == dilation*(k-1).")
    S = Ho * W
    if S % _LANE != 0 or _LANE % W != 0:
        raise NotImplementedError(
            "Pallas DilConv kernel requires H*W to tile into 128-lane rows.")

    # Largest lane-dense spatial tile that divides S (capped; amortizes per-step cost).
    TS = _LANE
    cand = (min(S, 2048) // _LANE) * _LANE
    while cand > _LANE:
        if S % cand == 0:
            TS = cand
            break
        cand -= _LANE
    rpt = TS // _LANE                                # 128-lane rows per output tile
    T = S // TS                                      # spatial tiles per sample
    off_max = d * (kH - 1) * W + d * (kW - 1)        # largest flat tap offset
    n_win = -(-(TS + off_max) // _LANE)              # 128-lane rows per input window
    NR = max((T - 1) * rpt + n_win,                  # rows the tiles will read
             -(-(p + (H + 2 * p) * W) // _LANE))     # rows to hold all padded input

    x = x_nchw.astype(jnp.float32)
    # Zero-pad H explicitly (tiny); W padding is handled by masking inside the kernel.
    xph = jnp.pad(x, ((0, 0), (0, 0), (p, p), (0, 0)))
    xf = xph.reshape(N, C_in, (H + 2 * p) * W)
    back = NR * _LANE - p - (H + 2 * p) * W
    xf = jnp.pad(xf, ((0, 0), (0, 0), (p, back)))
    # (N, NR, C_in, 128): flat spatial split into aligned 128-lane rows.
    xr = jnp.transpose(xf.reshape(N, C_in, NR, _LANE), (0, 2, 1, 3))

    # Weight layouts: depthwise taps (C_in, kH*kW), pointwise (C_out, C_in).
    dwk = jnp.transpose(dw_weight.astype(jnp.float32), (2, 0, 1)).reshape(C_in, kH * kW)
    pwm = jnp.transpose(pw_weight.astype(jnp.float32), (1, 0))

    conv_kernel = _make_conv_stats_kernel(n_win=n_win, C_in=C_in, C_out=C_out,
                                          kH=kH, kW=kW, dil=d, pad=p, W=W, TS=TS)

    win_specs = [
        pl.BlockSpec((1, 1, C_in, _LANE),
                     lambda n, t, j=j, r=rpt: (n, t * r + j, 0, 0))
        for j in range(n_win)
    ]
    z, stats = pl.pallas_call(
        conv_kernel,
        grid=(N, T),
        in_specs=win_specs + [
            pl.BlockSpec((C_in, kH * kW), lambda n, t: (0, 0)),
            pl.BlockSpec((C_out, C_in), lambda n, t: (0, 0)),
        ],
        out_specs=(
            pl.BlockSpec((1, C_out, TS), lambda n, t: (n, 0, t)),
            pl.BlockSpec((1, C_out, 2), lambda n, t: (n, 0, 0)),
        ),
        out_shape=(
            jax.ShapeDtypeStruct((N, C_out, S), jnp.float32),
            jax.ShapeDtypeStruct((N, C_out, 2), jnp.float32),
        ),
        compiler_params=pltpu.CompilerParams(
            dimension_semantics=("parallel", "arbitrary"),
            vmem_limit_bytes=32 * 1024 * 1024),
    )(*([xr] * n_win), dwk, pwm)

    bn_kernel = _make_bn_act_kernel(inv_count=1.0 / (N * S))
    out_flat = pl.pallas_call(
        bn_kernel,
        grid=(N, T),
        in_specs=[
            pl.BlockSpec((1, C_out, TS), lambda n, t: (n, 0, t)),
            pl.BlockSpec((N, C_out, 2), lambda n, t: (0, 0, 0)),
            pl.BlockSpec((C_out, 1), lambda n, t: (0, 0)),
            pl.BlockSpec((C_out, 1), lambda n, t: (0, 0)),
        ],
        out_specs=pl.BlockSpec((1, C_out, TS), lambda n, t: (n, 0, t)),
        out_shape=jax.ShapeDtypeStruct((N, C_out, S), jnp.float32),
        compiler_params=pltpu.CompilerParams(
            dimension_semantics=("parallel", "parallel"),
            vmem_limit_bytes=32 * 1024 * 1024),
    )(z, stats,
      gamma.reshape(C_out, 1).astype(jnp.float32),
      beta.reshape(C_out, 1).astype(jnp.float32))

    # Free reshape: (N, C_out, Ho*Wo) is already NCHW-contiguous.
    return out_flat.reshape(N, C_out, Ho, Wo)


def _reference(x_nchw, dw_weight, pw_weight, gamma, beta, *, stride, padding, dilation):
    """Pure-JAX reference (lax conv) for sanity-checking the kernels."""
    C_in = x_nchw.shape[1]
    C_out = pw_weight.shape[1]
    dw_oihw = jnp.transpose(dw_weight, (2, 0, 1))[:, None, :, :]   # (C_in,1,kH,kW)
    y = jax.lax.conv_general_dilated(
        x_nchw.astype(jnp.float32), dw_oihw,
        window_strides=(stride, stride), padding=((padding, padding),) * 2,
        rhs_dilation=(dilation, dilation), feature_group_count=C_in,
        dimension_numbers=("NCHW", "OIHW", "NCHW"))
    pw_oihw = jnp.transpose(pw_weight, (1, 0))[:, :, None, None]   # (C_out,C_in,1,1)
    z = jax.lax.conv_general_dilated(
        y, pw_oihw, window_strides=(1, 1), padding=((0, 0), (0, 0)),
        dimension_numbers=("NCHW", "OIHW", "NCHW"))
    mean = jnp.mean(z, axis=(0, 2, 3), keepdims=True)
    var = jnp.mean((z - mean) ** 2, axis=(0, 2, 3), keepdims=True)
    zn = (z - mean) * jax.lax.rsqrt(var + 1e-5)
    zn = zn * gamma.reshape(1, C_out, 1, 1) + beta.reshape(1, C_out, 1, 1)
    tmp = jnp.exp((zn - 0.145) / 0.073)
    return (1.005 + (0.06 - 1.005) / (1.0 + tmp)).astype(jnp.float32)


if __name__ == "__main__":
    # Shapes consistent with DilConv(C_in=4, C_out=8, k=3, stride=1, pad=2, dil=2)
    N, C_in, H, W = 2, 4, 16, 16
    C_out, k, stride, padding, dilation = 8, 3, 1, 2, 2

    key = jax.random.PRNGKey(0)
    kx, kdw, kpw, kg, kb = jax.random.split(key, 5)
    x = jax.random.normal(kx, (N, C_in, H, W), dtype=jnp.float32)
    # deterministic synthetic parameters (not a checkpoint load)
    dw_weight = 0.1 * jax.random.normal(kdw, (k, k, C_in), dtype=jnp.float32)
    pw_weight = 0.1 * jax.random.normal(kpw, (C_in, C_out), dtype=jnp.float32)
    gamma = 1.0 + 0.1 * jax.random.normal(kg, (C_out,), dtype=jnp.float32)
    beta = 0.1 * jax.random.normal(kb, (C_out,), dtype=jnp.float32)

    out = dilconv_forward(x, dw_weight, pw_weight, gamma, beta,
                          stride=stride, padding=padding, dilation=dilation)
    out = jax.block_until_ready(out)

    ref = _reference(x, dw_weight, pw_weight, gamma, beta,
                     stride=stride, padding=padding, dilation=dilation)
    ref = jax.block_until_ready(ref)

    assert out.shape == (N, C_out, H, W), out.shape
    err = float(jnp.max(jnp.abs(out - ref)))
    assert err < 5e-3, f"mismatch vs reference: max abs err = {err}"
    print("KERNEL_OK")
</pallas_src>

<mosaic_0001>
module attributes {stable_mosaic.version = 11 : i64} {
  func.func @kernel(%arg0: i32, %arg1: i32, %arg2: memref<1x1x4x128xf32, #tpu.memory_space<vmem>>, %arg3: memref<1x1x4x128xf32, #tpu.memory_space<vmem>>, %arg4: memref<1x1x4x128xf32, #tpu.memory_space<vmem>>, %arg5: memref<4x9xf32, #tpu.memory_space<vmem>>, %arg6: memref<8x4xf32, #tpu.memory_space<vmem>>, %arg7: memref<1x8x256xf32, #tpu.memory_space<vmem>>, %arg8: memref<1x8x2xf32, #tpu.memory_space<vmem>>) attributes {dimension_semantics = [#tpu.dimension_semantics<parallel>, #tpu.dimension_semantics<arbitrary>], iteration_bounds = array<i64: 2, 1>, scalar_prefetch = 0 : i64, scratch_operands = 0 : i64, tpu.core_type = #tpu.core_type<tc>, window_params = [{transform_indices = @transform_0, window_bounds = array<i64: 1, 1, 4, 128>}, {transform_indices = @transform_1, window_bounds = array<i64: 1, 1, 4, 128>}, {transform_indices = @transform_2, window_bounds = array<i64: 1, 1, 4, 128>}, {pipeline_mode = #tpu.pipeline_mode<synchronous>, transform_indices = @transform_3, window_bounds = array<i64: 4, 9>}, {pipeline_mode = #tpu.pipeline_mode<synchronous>, transform_indices = @transform_4, window_bounds = array<i64: 8, 4>}, {transform_indices = @transform_5, window_bounds = array<i64: 1, 8, 256>}, {transform_indices = @transform_6, window_bounds = array<i64: 1, 8, 2>}]} {
    %c0 = arith.constant 0 : index
    %c0_0 = arith.constant 0 : index
    %c0_1 = arith.constant 0 : index
    %c0_2 = arith.constant 0 : index
    %0 = vector.load %arg2[%c0, %c0_0, %c0_1, %c0_2] : memref<1x1x4x128xf32, #tpu.memory_space<vmem>>, vector<1x1x4x128xf32>
    %1 = vector.shape_cast %0 : vector<1x1x4x128xf32> to vector<4x128xf32>
    %c0_3 = arith.constant 0 : index
    %c0_4 = arith.constant 0 : index
    %c0_5 = arith.constant 0 : index
    %c0_6 = arith.constant 0 : index
    %2 = vector.load %arg3[%c0_3, %c0_4, %c0_5, %c0_6] : memref<1x1x4x128xf32, #tpu.memory_space<vmem>>, vector<1x1x4x128xf32>
    %3 = vector.shape_cast %2 : vector<1x1x4x128xf32> to vector<4x128xf32>
    %c0_7 = arith.constant 0 : index
    %c0_8 = arith.constant 0 : index
    %c0_9 = arith.constant 0 : index
    %c0_10 = arith.constant 0 : index
    %4 = vector.load %arg4[%c0_7, %c0_8, %c0_9, %c0_10] : memref<1x1x4x128xf32, #tpu.memory_space<vmem>>, vector<1x1x4x128xf32>
    %5 = vector.shape_cast %4 : vector<1x1x4x128xf32> to vector<4x128xf32>
    %6 = tpu.concatenate %1, %3, %5 in 1 : vector<4x128xf32>, vector<4x128xf32>, vector<4x128xf32> -> vector<4x384xf32>
    %c0_11 = arith.constant 0 : index
    %c0_12 = arith.constant 0 : index
    %7 = vector.load %arg5[%c0_11, %c0_12] : memref<4x9xf32, #tpu.memory_space<vmem>>, vector<4x9xf32>
    %c0_13 = arith.constant 0 : index
    %c0_14 = arith.constant 0 : index
    %8 = vector.load %arg6[%c0_13, %c0_14] : memref<8x4xf32, #tpu.memory_space<vmem>>, vector<8x4xf32>
    %9 = tpu.iota {dimensions = array<i32: 1>} : vector<1x256xi32>
    %c16_i32 = arith.constant 16 : i32
    %c0_i32 = arith.constant 0 : i32
    %10 = arith.cmpi eq, %c16_i32, %c0_i32 : i32
    %c1_i32 = arith.constant 1 : i32
    %11 = arith.select %10, %c1_i32, %c16_i32 : i32
    %12 = vector.broadcast %11 : i32 to vector<1x256xi32>
    %13 = arith.remsi %9, %12 : vector<1x256xi32>
    %c0_i32_15 = arith.constant 0 : i32
    %14 = vector.broadcast %c0_i32_15 : i32 to vector<1x256xi32>
    %15 = arith.cmpi ne, %13, %14 : vector<1x256xi32>
    %c0_i32_16 = arith.constant 0 : i32
    %16 = vector.broadcast %c0_i32_16 : i32 to vector<1x256xi32>
    %17 = arith.cmpi slt, %13, %16 : vector<1x256xi32>
    %c0_i32_17 = arith.constant 0 : i32
    %18 = arith.cmpi slt, %11, %c0_i32_17 : i32
    %19 = vector.broadcast %18 : i1 to vector<1x256xi1>
    %20 = vector.broadcast %19 : vector<1x256xi1> to vector<1x256xi1>
    %21 = arith.xori %17, %20 : vector<1x256xi1>
    %22 = arith.andi %21, %15 : vector<1x256xi1>
    %23 = vector.broadcast %11 : i32 to vector<1x256xi32>
    %24 = arith.addi %13, %23 : vector<1x256xi32>
    %25 = arith.select %22, %24, %13 : vector<1x256xi1>, vector<1x256xi32>
    %cst = arith.constant 0.000000e+00 : f32
    %26 = vector.broadcast %cst : f32 to vector<4x256xf32>
    %c2_i32 = arith.constant 2 : i32
    %27 = vector.broadcast %c2_i32 : i32 to vector<1x256xi32>
    %28 = arith.cmpi sge, %25, %27 : vector<1x256xi32>
    %c18_i32 = arith.constant 18 : i32
    %29 = vector.broadcast %c18_i32 : i32 to vector<1x256xi32>
    %30 = arith.cmpi slt, %25, %29 : vector<1x256xi32>
    %31 = arith.andi %28, %30 : vector<1x256xi1>
    %cst_18 = arith.constant 0.000000e+00 : f32
    %32 = vector.broadcast %cst_18 : f32 to vector<4x256xf32>
    %33 = vector.extract_strided_slice %7 {offsets = [0, 0], sizes = [4, 1], strides = [1, 1]} : vector<4x9xf32> to vector<4x1xf32>
    %34 = vector.extract_strided_slice %6 {offsets = [0, 0], sizes = [4, 256], strides = [1, 1]} : vector<4x384xf32> to vector<4x256xf32>
    %35 = vector.broadcast %33 : vector<4x1xf32> to vector<4x256xf32>
    %36 = arith.mulf %35, %34 : vector<4x256xf32>
    %37 = arith.addf %32, %36 : vector<4x256xf32>
    %38 = vector.extract_strided_slice %7 {offsets = [0, 3], sizes = [4, 1], strides = [1, 1]} : vector<4x9xf32> to vector<4x1xf32>
    %39 = vector.extract_strided_slice %6 {offsets = [0, 32], sizes = [4, 256], strides = [1, 1]} : vector<4x384xf32> to vector<4x256xf32>
    %40 = vector.broadcast %38 : vector<4x1xf32> to vector<4x256xf32>
    %41 = arith.mulf %40, %39 : vector<4x256xf32>
    %42 = arith.addf %37, %41 : vector<4x256xf32>
    %43 = vector.extract_strided_slice %7 {offsets = [0, 6], sizes = [4, 1], strides = [1, 1]} : vector<4x9xf32> to vector<4x1xf32>
    %44 = vector.extract_strided_slice %6 {offsets = [0, 64], sizes = [4, 256], strides = [1, 1]} : vector<4x384xf32> to vector<4x256xf32>
    %45 = vector.broadcast %43 : vector<4x1xf32> to vector<4x256xf32>
    %46 = arith.mulf %45, %44 : vector<4x256xf32>
    %47 = arith.addf %42, %46 : vector<4x256xf32>
    %cst_19 = arith.constant 0.000000e+00 : f32
    %48 = vector.shape_cast %31 : vector<1x256xi1> to vector<1x256xi1>
    %49 = vector.broadcast %48 : vector<1x256xi1> to vector<4x256xi1>
    %50 = vector.broadcast %cst_19 : f32 to vector<4x256xf32>
    %51 = arith.select %49, %47, %50 : vector<4x256xi1>, vector<4x256xf32>
    %52 = arith.addf %26, %51 : vector<4x256xf32>
    %c0_i32_20 = arith.constant 0 : i32
    %53 = vector.broadcast %c0_i32_20 : i32 to vector<1x256xi32>
    %54 = arith.cmpi sge, %25, %53 : vector<1x256xi32>
    %c16_i32_21 = arith.constant 16 : i32
    %55 = vector.broadcast %c16_i32_21 : i32 to vector<1x256xi32>
    %56 = arith.cmpi slt, %25, %55 : vector<1x256xi32>
    %57 = arith.andi %54, %56 : vector<1x256xi1>
    %cst_22 = arith.constant 0.000000e+00 : f32
    %58 = vector.broadcast %cst_22 : f32 to vector<4x256xf32>
    %59 = vector.extract_strided_slice %7 {offsets = [0, 1], sizes = [4, 1], strides = [1, 1]} : vector<4x9xf32> to vector<4x1xf32>
    %60 = vector.extract_strided_slice %6 {offsets = [0, 2], sizes = [4, 256], strides = [1, 1]} : vector<4x384xf32> to vector<4x256xf32>
    %61 = vector.broadcast %59 : vector<4x1xf32> to vector<4x256xf32>
    %62 = arith.mulf %61, %60 : vector<4x256xf32>
    %63 = arith.addf %58, %62 : vector<4x256xf32>
    %64 = vector.extract_strided_slice %7 {offsets = [0, 4], sizes = [4, 1], strides = [1, 1]} : vector<4x9xf32> to vector<4x1xf32>
    %65 = vector.extract_strided_slice %6 {offsets = [0, 34], sizes = [4, 256], strides = [1, 1]} : vector<4x384xf32> to vector<4x256xf32>
    %66 = vector.broadcast %64 : vector<4x1xf32> to vector<4x256xf32>
    %67 = arith.mulf %66, %65 : vector<4x256xf32>
    %68 = arith.addf %63, %67 : vector<4x256xf32>
    %69 = vector.extract_strided_slice %7 {offsets = [0, 7], sizes = [4, 1], strides = [1, 1]} : vector<4x9xf32> to vector<4x1xf32>
    %70 = vector.extract_strided_slice %6 {offsets = [0, 66], sizes = [4, 256], strides = [1, 1]} : vector<4x384xf32> to vector<4x256xf32>
    %71 = vector.broadcast %69 : vector<4x1xf32> to vector<4x256xf32>
    %72 = arith.mulf %71, %70 : vector<4x256xf32>
    %73 = arith.addf %68, %72 : vector<4x256xf32>
    %cst_23 = arith.constant 0.000000e+00 : f32
    %74 = vector.shape_cast %57 : vector<1x256xi1> to vector<1x256xi1>
    %75 = vector.broadcast %74 : vector<1x256xi1> to vector<4x256xi1>
    %76 = vector.broadcast %cst_23 : f32 to vector<4x256xf32>
    %77 = arith.select %75, %73, %76 : vector<4x256xi1>, vector<4x256xf32>
    %78 = arith.addf %52, %77 : vector<4x256xf32>
    %c-2_i32 = arith.constant -2 : i32
    %79 = vector.broadcast %c-2_i32 : i32 to vector<1x256xi32>
    %80 = arith.cmpi sge, %25, %79 : vector<1x256xi32>
    %c14_i32 = arith.constant 14 : i32
    %81 = vector.broadcast %c14_i32 : i32 to vector<1x256xi32>
    %82 = arith.cmpi slt, %25, %81 : vector<1x256xi32>
    %83 = arith.andi %80, %82 : vector<1x256xi1>
    %cst_24 = arith.constant 0.000000e+00 : f32
    %84 = vector.broadcast %cst_24 : f32 to vector<4x256xf32>
    %85 = vector.extract_strided_slice %7 {offsets = [0, 2], sizes = [4, 1], strides = [1, 1]} : vector<4x9xf32> to vector<4x1xf32>
    %86 = vector.extract_strided_slice %6 {offsets = [0, 4], sizes = [4, 256], strides = [1, 1]} : vector<4x384xf32> to vector<4x256xf32>
    %87 = vector.broadcast %85 : vector<4x1xf32> to vector<4x256xf32>
    %88 = arith.mulf %87, %86 : vector<4x256xf32>
    %89 = arith.addf %84, %88 : vector<4x256xf32>
    %90 = vector.extract_strided_slice %7 {offsets = [0, 5], sizes = [4, 1], strides = [1, 1]} : vector<4x9xf32> to vector<4x1xf32>
    %91 = vector.extract_strided_slice %6 {offsets = [0, 36], sizes = [4, 256], strides = [1, 1]} : vector<4x384xf32> to vector<4x256xf32>
    %92 = vector.broadcast %90 : vector<4x1xf32> to vector<4x256xf32>
    %93 = arith.mulf %92, %91 : vector<4x256xf32>
    %94 = arith.addf %89, %93 : vector<4x256xf32>
    %95 = vector.extract_strided_slice %7 {offsets = [0, 8], sizes = [4, 1], strides = [1, 1]} : vector<4x9xf32> to vector<4x1xf32>
    %96 = vector.extract_strided_slice %6 {offsets = [0, 68], sizes = [4, 256], strides = [1, 1]} : vector<4x384xf32> to vector<4x256xf32>
    %97 = vector.broadcast %95 : vector<4x1xf32> to vector<4x256xf32>
    %98 = arith.mulf %97, %96 : vector<4x256xf32>
    %99 = arith.addf %94, %98 : vector<4x256xf32>
    %cst_25 = arith.constant 0.000000e+00 : f32
    %100 = vector.shape_cast %83 : vector<1x256xi1> to vector<1x256xi1>
    %101 = vector.broadcast %100 : vector<1x256xi1> to vector<4x256xi1>
    %102 = vector.broadcast %cst_25 : f32 to vector<4x256xf32>
    %103 = arith.select %101, %99, %102 : vector<4x256xi1>, vector<4x256xf32>
    %104 = arith.addf %78, %103 : vector<4x256xf32>
    %cst_26 = arith.constant 0.000000e+00 : f32
    %105 = vector.broadcast %cst_26 : f32 to vector<8x256xf32>
    %106 = vector.extract_strided_slice %8 {offsets = [0, 0], sizes = [8, 1], strides = [1, 1]} : vector<8x4xf32> to vector<8x1xf32>
    %107 = vector.extract_strided_slice %104 {offsets = [0, 0], sizes = [1, 256], strides = [1, 1]} : vector<4x256xf32> to vector<1x256xf32>
    %108 = vector.broadcast %106 : vector<8x1xf32> to vector<8x256xf32>
    %109 = vector.broadcast %107 : vector<1x256xf32> to vector<8x256xf32>
    %110 = arith.mulf %108, %109 : vector<8x256xf32>
    %111 = arith.addf %105, %110 : vector<8x256xf32>
    %112 = vector.extract_strided_slice %8 {offsets = [0, 1], sizes = [8, 1], strides = [1, 1]} : vector<8x4xf32> to vector<8x1xf32>
    %113 = vector.extract_strided_slice %104 {offsets = [1, 0], sizes = [1, 256], strides = [1, 1]} : vector<4x256xf32> to vector<1x256xf32>
    %114 = vector.broadcast %112 : vector<8x1xf32> to vector<8x256xf32>
    %115 = vector.broadcast %113 : vector<1x256xf32> to vector<8x256xf32>
    %116 = arith.mulf %114, %115 : vector<8x256xf32>
    %117 = arith.addf %111, %116 : vector<8x256xf32>
    %118 = vector.extract_strided_slice %8 {offsets = [0, 2], sizes = [8, 1], strides = [1, 1]} : vector<8x4xf32> to vector<8x1xf32>
    %119 = vector.extract_strided_slice %104 {offsets = [2, 0], sizes = [1, 256], strides = [1, 1]} : vector<4x256xf32> to vector<1x256xf32>
    %120 = vector.broadcast %118 : vector<8x1xf32> to vector<8x256xf32>
    %121 = vector.broadcast %119 : vector<1x256xf32> to vector<8x256xf32>
    %122 = arith.mulf %120, %121 : vector<8x256xf32>
    %123 = arith.addf %117, %122 : vector<8x256xf32>
    %124 = vector.extract_strided_slice %8 {offsets = [0, 3], sizes = [8, 1], strides = [1, 1]} : vector<8x4xf32> to vector<8x1xf32>
    %125 = vector.extract_strided_slice %104 {offsets = [3, 0], sizes = [1, 256], strides = [1, 1]} : vector<4x256xf32> to vector<1x256xf32>
    %126 = vector.broadcast %124 : vector<8x1xf32> to vector<8x256xf32>
    %127 = vector.broadcast %125 : vector<1x256xf32> to vector<8x256xf32>
    %128 = arith.mulf %126, %127 : vector<8x256xf32>
    %129 = arith.addf %123, %128 : vector<8x256xf32>
    %c0_27 = arith.constant 0 : index
    %c0_28 = arith.constant 0 : index
    %c0_29 = arith.constant 0 : index
    %130 = vector.load %arg7[%c0_27, %c0_28, %c0_29] : memref<1x8x256xf32, #tpu.memory_space<vmem>>, vector<1x8x256xf32>
    %131 = vector.shape_cast %130 : vector<1x8x256xf32> to vector<8x256xf32>
    %132 = vector.shape_cast %129 : vector<8x256xf32> to vector<1x8x256xf32>
    tpu.vector_store %arg7[%c0_27, %c0_28, %c0_29], %132 {strides = array<i32>} : memref<1x8x256xf32, #tpu.memory_space<vmem>>, vector<1x8x256xf32>,
    %cst_30 = arith.constant dense<0.000000e+00> : vector<8xf32>
    %133 = vector.multi_reduction <add>, %129, %cst_30 [1] : vector<8x256xf32> to vector<8xf32>
    %134 = vector.shape_cast %133 : vector<8xf32> to vector<8x1xf32>
    %135 = arith.mulf %129, %129 : vector<8x256xf32>
    %cst_31 = arith.constant dense<0.000000e+00> : vector<8xf32>
    %136 = vector.multi_reduction <add>, %135, %cst_31 [1] : vector<8x256xf32> to vector<8xf32>
    %137 = vector.shape_cast %136 : vector<8xf32> to vector<8x1xf32>
    %c0_i32_32 = arith.constant 0 : i32
    %138 = arith.cmpi eq, %arg1, %c0_i32_32 : i32
    %139 = arith.extui %138 : i1 to i32
    %c0_i32_33 = arith.constant 0 : i32
    %140 = arith.cmpi ne, %139, %c0_i32_33 : i32
    scf.if %140 {
      %c0_36 = arith.constant 0 : index
      %c0_37 = arith.constant 0 : index
      %c0_38 = arith.constant 0 : index
      %144 = vector.load %arg8[%c0_36, %c0_37, %c0_38] : memref<1x8x2xf32, #tpu.memory_space<vmem>>, vector<1x8x1xf32>
      %145 = vector.shape_cast %144 : vector<1x8x1xf32> to vector<8x1xf32>
      %146 = vector.shape_cast %134 : vector<8x1xf32> to vector<1x8x1xf32>
      tpu.vector_store %arg8[%c0_36, %c0_37, %c0_38], %146 {strides = array<i32>} : memref<1x8x2xf32, #tpu.memory_space<vmem>>, vector<1x8x1xf32>,
      %c0_39 = arith.constant 0 : index
      %c0_40 = arith.constant 0 : index
      %c1 = arith.constant 1 : index
      %147 = vector.load %arg8[%c0_39, %c0_40, %c1] : memref<1x8x2xf32, #tpu.memory_space<vmem>>, vector<1x8x1xf32>
      %148 = vector.shape_cast %147 : vector<1x8x1xf32> to vector<8x1xf32>
      %149 = vector.shape_cast %137 : vector<8x1xf32> to vector<1x8x1xf32>
      tpu.vector_store %arg8[%c0_39, %c0_40, %c1], %149 {strides = array<i32>} : memref<1x8x2xf32, #tpu.memory_space<vmem>>, vector<1x8x1xf32>,
    } else {
    }
    %c0_i32_34 = arith.constant 0 : i32
    %141 = arith.cmpi sgt, %arg1, %c0_i32_34 : i32
    %142 = arith.extui %141 : i1 to i32
    %c0_i32_35 = arith.constant 0 : i32
    %143 = arith.cmpi ne, %142, %c0_i32_35 : i32
    scf.if %143 {
      %c0_36 = arith.constant 0 : index
      %c0_37 = arith.constant 0 : index
      %c0_38 = arith.constant 0 : index
      %144 = vector.load %arg8[%c0_36, %c0_37, %c0_38] : memref<1x8x2xf32, #tpu.memory_space<vmem>>, vector<1x8x1xf32>
      %145 = vector.shape_cast %144 : vector<1x8x1xf32> to vector<8x1xf32>
      %146 = arith.addf %145, %134 : vector<8x1xf32>
      %c0_39 = arith.constant 0 : index
      %c0_40 = arith.constant 0 : index
      %c0_41 = arith.constant 0 : index
      %147 = vector.load %arg8[%c0_39, %c0_40, %c0_41] : memref<1x8x2xf32, #tpu.memory_space<vmem>>, vector<1x8x1xf32>
      %148 = vector.shape_cast %147 : vector<1x8x1xf32> to vector<8x1xf32>
      %149 = vector.shape_cast %146 : vector<8x1xf32> to vector<1x8x1xf32>
      tpu.vector_store %arg8[%c0_39, %c0_40, %c0_41], %149 {strides = array<i32>} : memref<1x8x2xf32, #tpu.memory_space<vmem>>, vector<1x8x1xf32>,
      %c0_42 = arith.constant 0 : index
      %c0_43 = arith.constant 0 : index
      %c1 = arith.constant 1 : index
      %150 = vector.load %arg8[%c0_42, %c0_43, %c1] : memref<1x8x2xf32, #tpu.memory_space<vmem>>, vector<1x8x1xf32>
      %151 = vector.shape_cast %150 : vector<1x8x1xf32> to vector<8x1xf32>
      %152 = arith.addf %151, %137 : vector<8x1xf32>
      %c0_44 = arith.constant 0 : index
      %c0_45 = arith.constant 0 : index
      %c1_46 = arith.constant 1 : index
      %153 = vector.load %arg8[%c0_44, %c0_45, %c1_46] : memref<1x8x2xf32, #tpu.memory_space<vmem>>, vector<1x8x1xf32>
      %154 = vector.shape_cast %153 : vector<1x8x1xf32> to vector<8x1xf32>
      %155 = vector.shape_cast %152 : vector<8x1xf32> to vector<1x8x1xf32>
      tpu.vector_store %arg8[%c0_44, %c0_45, %c1_46], %155 {strides = array<i32>} : memref<1x8x2xf32, #tpu.memory_space<vmem>>, vector<1x8x1xf32>,
    } else {
    }
    return
  }
  func.func @transform_0(%arg0: i32, %arg1: i32) -> (i32, i32, i32, i32) {
    %c2_i32 = arith.constant 2 : i32
    %0 = arith.muli %arg1, %c2_i32 : i32
    %c0_i32 = arith.constant 0 : i32
    %1 = arith.addi %0, %c0_i32 : i32
    %c0_i32_0 = arith.constant 0 : i32
    %c0_i32_1 = arith.constant 0 : i32
    %c0_i32_2 = arith.constant 0 : i32
    return %arg0, %1, %c0_i32_0, %c0_i32_1 : i32, i32, i32, i32
  }
  func.func @transform_1(%arg0: i32, %arg1: i32) -> (i32, i32, i32, i32) {
    %c2_i32 = arith.constant 2 : i32
    %0 = arith.muli %arg1, %c2_i32 : i32
    %c1_i32 = arith.constant 1 : i32
    %1 = arith.addi %0, %c1_i32 : i32
    %c0_i32 = arith.constant 0 : i32
    %c0_i32_0 = arith.constant 0 : i32
    %c0_i32_1 = arith.constant 0 : i32
    return %arg0, %1, %c0_i32, %c0_i32_0 : i32, i32, i32, i32
  }
  func.func @transform_2(%arg0: i32, %arg1: i32) -> (i32, i32, i32, i32) {
    %c2_i32 = arith.constant 2 : i32
    %0 = arith.muli %arg1, %c2_i32 : i32
    %c2_i32_0 = arith.constant 2 : i32
    %1 = arith.addi %0, %c2_i32_0 : i32
    %c0_i32 = arith.constant 0 : i32
    %c0_i32_1 = arith.constant 0 : i32
    %c0_i32_2 = arith.constant 0 : i32
    return %arg0, %1, %c0_i32, %c0_i32_1 : i32, i32, i32, i32
  }
  func.func @transform_3(%arg0: i32, %arg1: i32) -> (i32, i32) {
    %c0_i32 = arith.constant 0 : i32
    %c0_i32_0 = arith.constant 0 : i32
    %c0_i32_1 = arith.constant 0 : i32
    return %c0_i32, %c0_i32_0 : i32, i32
  }
  func.func @transform_4(%arg0: i32, %arg1: i32) -> (i32, i32) {
    %c0_i32 = arith.constant 0 : i32
    %c0_i32_0 = arith.constant 0 : i32
    %c0_i32_1 = arith.constant 0 : i32
    return %c0_i32, %c0_i32_0 : i32, i32
  }
  func.func @transform_5(%arg0: i32, %arg1: i32) -> (i32, i32, i32) {
    %c0_i32 = arith.constant 0 : i32
    %c0_i32_0 = arith.constant 0 : i32
    return %arg0, %c0_i32, %arg1 : i32, i32, i32
  }
  func.func @transform_6(%arg0: i32, %arg1: i32) -> (i32, i32, i32) {
    %c0_i32 = arith.constant 0 : i32
    %c0_i32_0 = arith.constant 0 : i32
    %c0_i32_1 = arith.constant 0 : i32
    return %arg0, %c0_i32, %c0_i32_0 : i32, i32, i32
  }
}

</mosaic_0001>

<bundles_post_ra>
// kernel: tpu_custom_call.1
= control target key start
LH: loop header
LB: loop body
LE: loop exit
PB: predicated region body
PF: predicated region fallthrough
CT: control target
= control target key end

     0   :  { %s1627_s0 = inlined_call_operand.hbm [shape: f32[2,3,4,128], index: 0, kind: input, shape index: {}]   ;;  %s1628_s1 = inlined_call_operand.hbm [shape: f32[2,3,4,128], index: 1, kind: input, shape index: {}]   ;;  %s1629_s2 = inlined_call_operand.hbm [shape: f32[2,3,4,128], index: 2, kind: input, shape index: {}]   ;;  %s1630_s3 = inlined_call_operand.vmem [shape: f32[4,9], index: 3, kind: input, shape index: {}]   ;;  %s1631_s4 = inlined_call_operand.vmem [shape: f32[8,4], index: 4, kind: input, shape index: {}]   ;;  %s1632_s5 = inlined_call_operand.hbm [shape: f32[2,8,256], index: 5, kind: output, shape index: {0}]   ;;  %s1633_s6 = inlined_call_operand.vmem [shape: f32[2,8,2], index: 6, kind: output, shape index: {1}]  }
   0x1   :  { %1646 = sst [smem:[#allocation19_spill]] %s1627_s0 }
   0x2   :  { %1647 = sst [smem:[#allocation20_spill]] %s1628_s1 }
   0x3   :  { %12 = vsyncpa [#allocation3], 0 }
   0x4   :  { %14 = vsyncpa [#allocation3 + $0x1], 0 }
   0x5   :  { %15 = vsyncpa [#allocation6], 0 }
   0x6   :  { %17 = vsyncpa [#allocation6 + $0x1], 0 }
   0x7   :  { %18 = vsyncpa [#allocation4], 0 }
   0x8   :  { %20 = vsyncpa [#allocation4 + $0x1], 0  ;;  %s1300_s21 = smov 0   ;;  %s1302_s22 = smov 0  }
   0x9   :  { %s1304_s23 = smov 0   ;;  %s1306_s24 = smov 0  }
   0xa   :  { %s1308_s25 = smov 0   ;;  %s1310_s26 = smov 0  }
   0xb LB: > { %1648 = sst [smem:[#allocation12_spill]] %s1226_s21  ;;  %s1331_s27 = sadd.s32 4294967295, %s1246_s26   ;;  %s1246_s26 = sphi %s1310_s26, %s26_s26   ;;  %s1242_s25 = sphi %s1308_s25, %s1679_s25   ;;  %s1238_s24 = sphi %s1306_s24, %s1682_s24   ;;  %s1234_s23 = sphi %s1304_s23, %s1677_s23   ;;  %s1230_s22 = sphi %s1302_s22, %s1681_s22   ;;  %s1226_s21 = sphi %s1300_s21, %s1680_s21  }
   0xc   : > { %1649 = sst [smem:[#allocation13_spill]] %s1234_s23  ;;  %s948_s28 = sadd.s32 4294967294, %s1246_s26  }
   0xd   : > { %1650 = sst [smem:[#allocation14_spill]] %s1242_s25  ;;  %s38_s29 = sadd.s32 1, %s1242_s25 }
   0xe   : > { %1651 = sst [smem:[#allocation15_spill]] %s1246_s26  ;;  %s49_s30 = sadd.s32 1, %s1234_s23 }
   0xf   : > { %p40_p0 = scmp.ge.s32.totalorder %s38_s29, 2  ;;  %p56_p1 = scmp.ne.s32.totalorder %s1234_s23, %s1230_s22 }
  0x10   : > { %p57_p2 = scmp.eq.s32.totalorder %s1246_s26, 0  ;;  %p62_p3 = scmp.ne.s32.totalorder %s1230_s22, %s1226_s21 }
  0x11   : > { %s1684_s29 = smov (%p40_p0, %s38_s29), 0  ;;  %p63_p5 = scmp.eq.s32.totalorder %s1331_s27, 0 }
  0x12   : > { %1652 = sst [smem:[#allocation16_spill]] %s1684_s29  ;;  %p1343_p4 = por %p57_p2, %p56_p1 }
  0x13   : > { %s44_s8 = ssub.s32 %s1242_s25, %s1684_s29  ;;  %p194_p6 = scmp.eq.s32.totalorder %s1331_s27, 1 }
  0x14   : > { %p47_p7 = scmp.eq.s32.totalorder %s44_s8, 0  ;;  %p1351_p8 = por %p63_p5, %p62_p3 }
  0x15   : > { %p1355_p9 = por %p194_p6, %p56_p1  ;;  %p200_p10 = scmp.eq.s32.totalorder %s948_s28, 1 }
  0x16   : > { %s1654_s9 = scalar_select %p1351_p8, 1, 0 }
  0x17   : > { %s1655_s10 = scalar_select %p1355_p9, 1, 0 }
  0x18   : > { %s1360_s11 = scalar_select %p47_p7, %s1234_s23, %s49_s30  }
  0x19   : > { %p1362_p11 = por %p200_p10, %p62_p3  ;;  %p992_p13 = scmp.lt.s32.totalorder %s1246_s26, 2 }
  0x1a   : > { %1656 = sst [smem:[#allocation17_spill]] %s1360_s11  ;;  %s1634_s13 = sand.u32 1, %s1234_s23  }
  0x1b   : > { %s1657_s12 = scalar_select %p1362_p11, 1, 0 }
  0x1c   : > { %s1371_s14 = sshll.u32 %s1634_s13, 2  ;;  %s1374_s15 = smul.u32 192, %s1242_s25 }
  0x1d   : > { %1658 = sst [smem:[#allocation18_spill]] %s1657_s12  ;;  %p1378_p0 = pnand %p992_p13, %p1343_p4 }
  0x1e   : > { %s273_s17 = sand.u32 1, %s1246_s26   ;;  %s1660_s1 = sld [smem:[#allocation20_spill]] }
  0x1f   : > { %s1659_s16 = scalar_select %p1378_p0, 1, 0 }
  0x20   : > { %s277_s30 = scalar_lea.vmem [#allocation5], %s1371_s14  ;;  %s1393_s7 = scalar_lea.sflag [#allocation6], %s273_s17 }
  0x21   : > { %s288_s8 = sshll.u32 %s277_s30, 4  ;;  %p1398_p3 = pneg %p1378_p0  ;;  %s1390_s8 = int_to_ptr.vmem [resolvable:$true] %s288_s8 }
  0x24   : > { %s837_s20 = scalar_lea.hbm %s1660_s1, %s1374_s15  ;;  %s1073_s30 = scalar_lea.hbm %s1660_s1, 384 }
  0x25   : > { %s1387_s28 = scalar_lea.hbm %s837_s20, 64  ;;  %s1098_s13 = scalar_lea.hbm %s837_s20, 128 }
  0x26   : > { %p1069_p2 = scmp.ne.s32.totalorder %s1387_s28, %s1098_s13  ;;  %p1074_p6 = scmp.lt.u32.totalorder %s1387_s28, %s1660_s1 }
  0x27   : > { %p1075_p7 = scmp.lt.u32.totalorder %s1073_s30, %s1098_s13  ;;  %p1077_p13 = scmp.lt.u32.totalorder %s1098_s13, %s1387_s28 }
  0x28   : > { %p1071_p4 = pnand %p1398_p3, %p1069_p2 }
  0x29   : > { %p1076_p10 = por %p1075_p7, %p1074_p6 }
  0x2a   : > { %p1072_p5 = pneg %p1071_p4 }
  0x2b   : > { %p1078_p12 = por %p1077_p13, %p1076_p10 }
  0x2d   : > { %p1079_p1 = pnand %p1078_p12, %p1072_p5 }
  0x2f   : > { %1082 = shalt.err (!%p1079_p1)
}
  0x30   : > { %s1083_s17 = scalar_lea.vmem %s1390_s8, 64  ;;  %s1248_s20 = smov [#allocation5]  }
  0x31   : > { %p1084_p2 = scmp.ne.s32.totalorder %s1390_s8, %s1083_s17  ;;  %s1088_s18 = sshll.u32 %s1248_s20, 4  ;;  %s1089_s18 = int_to_ptr.vmem [resolvable:$false] %s1088_s18 }
  0x32   : > { %s1090_s25 = scalar_lea.vmem %s1089_s18, 128  ;;  %p1091_p9 = scmp.lt.s32.totalorder %s1390_s8, %s1089_s18 }
  0x33   : > { %p1086_p4 = pnand %p1084_p2, %p1398_p3  ;;  %p1092_p8 = scmp.lt.s32.totalorder %s1090_s25, %s1083_s17 }
  0x35   : > { %p1087_p11 = pneg %p1086_p4  ;;  %p1093_p6 = por %p1092_p8, %p1091_p9 }
  0x37   : > { %p1094_p7 = pnand %p1093_p6, %p1087_p11 }
  0x39   : > { %1097 = shalt.err (!%p1094_p7)
}
  0x3a   : > { %984 = dma.hbm_to_vmem [thread:$0]  (!%p1378_p0), %s1387_s28, 64, %s1390_s8, %s1393_s7  }
  0x3b   : > { %p315_p12 = scmp.lt.s32.totalorder %s1246_s26, 3  ;;  %p1662_p1 = scmp.ge.s32.totalorder %s1246_s26, 1 }
  0x3c   : > { %s1664_s0 = sld [smem:[#allocation19_spill]]  ;;  %s256_s17 = scalar_lea.vmem [#allocation2], %s1371_s14 }
  0x3d   : > { %p1425_p5 = pnand %p1662_p1, %p315_p12  ;;  %s266_s20 = sshll.u32 %s256_s17, 4  ;;  %s267_s20 = int_to_ptr.vmem [resolvable:$true] %s266_s20 }
  0x3e   : > { %s1665_s18 = sand.u32 1, %s1234_s23  }
  0x3f   : > { %s1663_s11 = scalar_select %p1425_p5, 1, 0 }
  0x40   : > { %s253_s28 = scalar_lea.sflag [#allocation3], %s1665_s18 }
  0x42   : > { %s1433_s30 = scalar_lea.hbm %s1664_s0, %s1374_s15  ;;  %s1104_s13 = scalar_lea.hbm %s1664_s0, 384 }
  0x43   : > { %s1099_s8 = scalar_lea.hbm %s1433_s30, 64  ;;  %p1105_p10 = scmp.lt.u32.totalorder %s1433_s30, %s1664_s0 }
  0x44   : > { %p1100_p8 = scmp.ne.s32.totalorder %s1433_s30, %s1099_s8  ;;  %p1106_p13 = scmp.lt.u32.totalorder %s1104_s13, %s1099_s8 }
  0x45   : > { %p1108_p4 = scmp.lt.u32.totalorder %s1099_s8, %s1433_s30 }
  0x46   : > { %p1102_p9 = pnand %p1100_p8, %p1398_p3  ;;  %p1107_p2 = por %p1106_p13, %p1105_p10 }
  0x48   : > { %p1103_p11 = pneg %p1102_p9  ;;  %p1109_p6 = por %p1108_p4, %p1107_p2 }
  0x4a   : > { %p1110_p7 = pnand %p1109_p6, %p1103_p11 }
  0x4c   : > { %1113 = shalt.err (!%p1110_p7)
}
  0x4d   : > { %s1114_s17 = scalar_lea.vmem %s267_s20, 64  ;;  %s1249_s18 = smov [#allocation2]  }
  0x4e   : > { %p1115_p12 = scmp.ne.s32.totalorder %s267_s20, %s1114_s17  ;;  %s1119_s23 = sshll.u32 %s1249_s18, 4  ;;  %s1120_s23 = int_to_ptr.vmem [resolvable:$false] %s1119_s23 }
  0x4f   : > { %s1121_s1 = scalar_lea.vmem %s1120_s23, 128  ;;  %p1122_p9 = scmp.lt.s32.totalorder %s267_s20, %s1120_s23 }
  0x50   : > { %p1117_p1 = pnand %p1115_p12, %p1398_p3  ;;  %p1123_p5 = scmp.lt.s32.totalorder %s1121_s1, %s1114_s17 }
  0x52   : > { %p1118_p8 = pneg %p1117_p1  ;;  %p1124_p0 = por %p1123_p5, %p1122_p9 }
  0x54   : > { %p1125_p10 = pnand %p1124_p0, %p1118_p8 }
  0x56   : > { %1128 = shalt.err (!%p1125_p10)
}
  0x57   : > { %p1666_p13 = scmp.ne.s32.totalorder %s1659_s16, 0  ;;  %s846_s25 = scalar_lea.hbm %s1629_s2, %s1374_s15 }
  0x58   : > { %s299_s13 = scalar_lea.vmem [#allocation7], %s1371_s14  ;;  %s847_s18 = scalar_lea.hbm %s846_s25, 128 }
  0x59   : > { %981 = dma.hbm_to_vmem [thread:$0]  (!%p1666_p13), %s1433_s30, 64, %s267_s20, %s253_s28  }
  0x5a   : > { %s310_s19 = sshll.u32 %s299_s13, 4  ;;  %s1159_s23 = scalar_lea.hbm %s846_s25, 192  ;;  %s311_s19 = int_to_ptr.vmem [resolvable:$true] %s310_s19 }
  0x5b   : > { %p1130_p11 = scmp.ne.s32.totalorder %s847_s18, %s1159_s23  ;;  %s1134_s0 = scalar_lea.hbm %s1629_s2, 384 }
  0x5c   : > { %p1135_p2 = scmp.lt.u32.totalorder %s847_s18, %s1629_s2  ;;  %p1136_p4 = scmp.lt.u32.totalorder %s1134_s0, %s1159_s23 }
  0x5d   : > { %p1132_p0 = pnand %p1130_p11, %p1398_p3  ;;  %p1138_p7 = scmp.lt.u32.totalorder %s1159_s23, %s847_s18 }
  0x5e   : > { %p1137_p6 = por %p1136_p4, %p1135_p2 }
  0x5f   : > { %p1133_p5 = pneg %p1132_p0 }
  0x60   : > { %p1139_p12 = por %p1138_p7, %p1137_p6 }
  0x62   : > { %p1140_p1 = pnand %p1139_p12, %p1133_p5 }
  0x64   : > { %1143 = shalt.err (!%p1140_p1)
}
  0x65   : > { %s1144_s14 = scalar_lea.vmem %s311_s19, 64  ;;  %s1250_s15 = smov [#allocation7]  }
  0x66   : > { %p1145_p8 = scmp.ne.s32.totalorder %s311_s19, %s1144_s14  ;;  %s1149_s30 = sshll.u32 %s1250_s15, 4  ;;  %s1150_s30 = int_to_ptr.vmem [resolvable:$false] %s1149_s30 }
  0x67   : > { %s1151_s20 = scalar_lea.vmem %s1150_s30, 128  ;;  %p1152_p11 = scmp.lt.s32.totalorder %s311_s19, %s1150_s30 }
  0x68   : > { %p1147_p9 = pnand %p1145_p8, %p1398_p3  ;;  %p1153_p0 = scmp.lt.s32.totalorder %s1151_s20, %s1144_s14 }
  0x6a   : > { %p1148_p10 = pneg %p1147_p9  ;;  %p1154_p13 = por %p1153_p0, %p1152_p11 }
  0x6c   : > { %p1155_p2 = pnand %p1154_p13, %p1148_p10 }
  0x6e   : > { %1158 = shalt.err (!%p1155_p2)
}
  0x6f   : > { %p1667_p4 = scmp.ne.s32.totalorder %s1659_s16, 0  ;;  %p1668_p5 = scmp.ne.s32.totalorder %s1663_s11, 0 }
  0x70   : > { %s1476_s0 = sand.u32 (!%p1668_p5), 1, %s1230_s22   ;;  %p1669_p3 = scmp.ne.s32.totalorder (!%p1668_p5), %s1654_s9, 0 }
  0x71   : > { %987 = dma.hbm_to_vmem [thread:$0]  (!%p1667_p4), %s847_s18, 64, %s311_s19, %s1393_s7  }
  0x72   : > { %319 = sbr.rel (%p1668_p5) target bundleno = 684 (0x2ac), region = 40  ;;  %s1479_s21 = sshll.u32 (!%p1668_p5), %s1476_s0, 2 }
  0x73   : > { %s322_s29 = scalar_lea.sflag (!%p1668_p5), [#allocation3], %s1476_s0  ;;  %s325_s12 = scalar_lea.vmem (!%p1668_p5), [#allocation2], %s1479_s21 }
  0x79   : > { %1213 = dma.done.wait (%p1669_p3), %s322_s29, 64  }
  0x7a   : > { %1215 = vsyncadd (%p1669_p3), %s322_s29, 4294967232  ;;  %s330_s16 = sand.u32 1, %s1331_s27   ;;  %s334_s11 = scalar_lea.vmem [#allocation5], %s1479_s21 }
  0x7b   : > { %s331_s7 = scalar_lea.sflag [#allocation6], %s330_s16 }
  0x7c   : > { %1217 = dma.done.wait (%p1669_p3), %s331_s7, 128  }
  0x7d   : > { %1219 = vsyncadd (%p1669_p3), %s331_s7, 4294967168  ;;  %v1251_v0 = vmov 4   ;;  %v1252_v1 = vmov 7   ;;  %v399_v2 = vld [vmem:[%s1630_s3] sm:$0xf]  ;;  %v1253_v3 = vmov 5  }
  0x7e   : > { %1055 = vset.pattern.permute.xlu0 %v1251_v0  ;;  %1057 = vset.pattern.permute.xlu1 %v1252_v1  ;;  %v1254_v4 = vmov 8   ;;  %v1255_v5 = vmov 3   ;;  %v1256_v6 = vmov 1   ;;  %v1257_v7 = vmov 6   ;;  %v1499_v10 = vld [vmem:[%s325_s12] sm:$0xf] }
  0x7f   : > { %514 = vperm.xlu0 %1055, %v399_v2   ;;  %538 = vperm.xlu1 %1057, %v399_v2   ;;  %v1258_v8 = vmov 2   ;;  %v1259_v9 = vmov 0   ;;  %v1503_v11 = vld [vmem:[%s334_s11] sm:$0xf]  ;;  %s343_s27 = scalar_lea.vmem [#allocation7], %s1479_s21  ;;  %s1260_s9 = smov 96  }
  0x80   : > { %v1508_v15 = vld [vmem:[%s343_s27] sm:$0xf]  ;;  %s1261_s8 = smov 64   ;;  %v1535_v29 = vld [vmem:[%s1631_s4] sm:$0xff]  ;;  %vm459_vm0 = vcmask 785408   ;;  %vm482_vm1 = vcmask 523264  }
  0x81   : > { %s1262_s19 = smov 126   ;;  %s1263_s18 = smov 124   ;;  %vm574_vm3 = vcmask 1031168   ;;  %vm660_vm4 = vcmask 1014784  }
  0x82   : > { %s961_s23 = sshll.u32 %s1476_s0, 4  ;;  %s968_s1 = sshll.u32 %s1238_s24, 8 }
  0x83   : > { %1056 = vset.pattern.permute.xlu0 %v1253_v3  ;;  %1058 = vset.pattern.permute.xlu1 %v1254_v4  ;;  %s379_s17 = scalar_lea.vmem [#allocation8], %s961_s23  ;;  %s1579_s20 = scalar_lea.hbm %s1632_s5, %s968_s1 }
  0x84   : > { %600 = vperm.xlu0 %1056, %v399_v2   ;;  %624 = vperm.xlu1 %1058, %v399_v2   ;;  %s785_s14 = sshll.u32 %s379_s17, 4  ;;  %s765_s21 = scalar_lea.sflag [#allocation4], %s1476_s0  ;;  %s786_s14 = int_to_ptr.vmem [resolvable:$true] %s785_s14 }
  0x85   : > { %s1160_s29 = scalar_lea.vmem %s786_s14, 256  ;;  %p1670_p6 = scmp.ne.s32.totalorder %s1655_s10, 0 }
  0x86   : > { %p1161_p13 = scmp.ne.s32.totalorder %s786_s14, %s1160_s29  ;;  %s1264_s12 = smov [#allocation8]  }
  0x87   : > { %s1164_s16 = sshll.u32 %s1264_s12, 4  ;;  %s1165_s16 = int_to_ptr.vmem [resolvable:$false] %s1164_s16 }
  0x88   : > { %1059 = vset.pattern.permute.xlu1 %v1255_v5  ;;  %1060 = vset.pattern.permute.xlu0 %v1256_v6  ;;  %p1162_p7 = pnand %p1161_p13, %p1670_p6  ;;  %s1166_s7 = scalar_lea.vmem %s1165_s16, 512 }
  0x89   : > { %444 = vperm.xlu1 %1059, %v399_v2   ;;  %504 = vperm.xlu0 %1060, %v399_v2   ;;  %p1167_p1 = scmp.lt.s32.totalorder %s786_s14, %s1165_s16  ;;  %p1168_p8 = scmp.lt.s32.totalorder %s1166_s7, %s1160_s29 }
  0x8a   : > { %p1163_p12 = pneg %p1162_p7 }
  0x8b   : > { %p1169_p9 = por %p1168_p8, %p1167_p1 }
  0x8d   : > { %1061 = vset.pattern.permute.xlu1 %v1257_v7  ;;  %1063 = vset.pattern.permute.xlu0 %v1259_v9  ;;  %p1170_p10 = pnand %p1169_p9, %p1163_p12 }
  0x8e   : > { %467 = vperm.xlu1 %1061, %v399_v2  }
  0x92   : > { %1062 = vset.pattern.permute.xlu1 %v1258_v8 }
  0x93   : > { %590 = vperm.xlu1 %1062, %v399_v2  }
  0x97   : > { %1064 = vset.pattern.permute.xlu1 %v1259_v9 }
  0xfe   : > { %v515_v12 = vpop.permute.xlu0 %514  ;;  %v539_v20 = vpop.permute.xlu1 %538 }
  0xff   : > { %v517_v13 = vmul.f32 %v515_v12, %v1499_v10  ;;  %v518_v14 = vmul.f32 %v515_v12, %v1503_v11  ;;  %v519_v16 = vmul.f32 %v515_v12, %v1508_v15  ;;  %v541_v22 = vmul.f32 %v539_v20, %v1499_v10 }
 0x100   : > { %v542_v23 = vmul.f32 %v539_v20, %v1503_v11  ;;  %v543_v26 = vmul.f32 %v539_v20, %v1508_v15 }
 0x101   : > { %525 = vrot.lane.b32.xlu1 %v518_v14, %s1260_s9  ;;  %523 = vrot.lane.b32.xlu0 %v517_v13, %s1260_s9 }
 0x103   : > { %v601_v17 = vpop.permute.xlu0 %600  ;;  %v625_v24 = vpop.permute.xlu1 %624 }
 0x104   : > { %v603_v18 = vmul.f32 %v601_v17, %v1499_v10  ;;  %v604_v19 = vmul.f32 %v601_v17, %v1503_v11  ;;  %v605_v21 = vmul.f32 %v601_v17, %v1508_v15  ;;  %v627_v25 = vmul.f32 %v625_v24, %v1499_v10 }
 0x105   : > { %527 = vrot.lane.b32.xlu0 %v519_v16, %s1260_s9  ;;  %v628_v27 = vmul.f32 %v625_v24, %v1503_v11  ;;  %v629_v28 = vmul.f32 %v625_v24, %v1508_v15 }
 0x106   : > { %609 = vrot.lane.b32.xlu1 %v603_v18, %s1260_s9 }
 0x108   : > { %v445_v30 = vpop.permute.xlu1 %444  ;;  %v505_v39 = vpop.permute.xlu0 %504 }
 0x109   : > { %611 = vrot.lane.b32.xlu0 %v604_v19, %s1260_s9  ;;  %v447_v31 = vmul.f32 %v445_v30, %v1499_v10  ;;  %v448_v32 = vmul.f32 %v445_v30, %v1503_v11  ;;  %v449_v33 = vmul.f32 %v445_v30, %v1508_v15  ;;  %v509_v47 = vmul.f32 %v505_v39, %v1508_v15 }
 0x10a   : > { %613 = vrot.lane.b32.xlu1 %v605_v21, %s1260_s9  ;;  %v508_v50 = vmul.f32 %v505_v39, %v1503_v11 }
 0x10d   : > { %547 = vrot.lane.b32.xlu0 %v541_v22, %s1261_s8  ;;  %v468_v34 = vpop.permute.xlu1 %467 }
 0x10e   : > { %549 = vrot.lane.b32.xlu1 %v542_v23, %s1261_s8  ;;  %v470_v35 = vmul.f32 %v468_v34, %v1499_v10  ;;  %v471_v36 = vmul.f32 %v468_v34, %v1503_v11  ;;  %v472_v37 = vmul.f32 %v468_v34, %v1508_v15 }
 0x111   : > { %551 = vrot.lane.b32.xlu0 %v543_v26, %s1261_s8 }
 0x112   : > { %633 = vrot.lane.b32.xlu1 %v627_v25, %s1261_s8  ;;  %v591_v38 = vpop.permute.xlu1 %590 }
 0x113   : > { %v593_v58 = vmul.f32 %v591_v38, %v1499_v10  ;;  %v595_v59 = vmul.f32 %v591_v38, %v1508_v15  ;;  %v594_v4 = vmul.f32 %v591_v38, %v1503_v11 }
 0x115   : > { %635 = vrot.lane.b32.xlu0 %v628_v27, %s1261_s8 }
 0x116   : > { %637 = vrot.lane.b32.xlu1 %v629_v28, %s1261_s8 }
 0x119   : > { %436 = vperm.xlu0 %1063, %v399_v2  }
 0x11a   : > { %671 = vperm.xlu1 %1064, %v1535_v29  }
 0x11d   : > { %1065 = vset.pattern.permute.xlu0 %v1256_v6 }
 0x11e   : > { %687 = vperm.xlu0 %1065, %v1535_v29   ;;  %453 = vrot.lane.b32.xlu1 %v447_v31, %s1260_s9 }
 0x11f   : > { %1066 = vset.pattern.permute.xlu1 %v1258_v8 }
 0x122   : > { %455 = vrot.lane.b32.xlu1 %v448_v32, %s1260_s9  ;;  %457 = vrot.lane.b32.xlu0 %v449_v33, %s1260_s9 }
 0x123   : > { %1067 = vset.pattern.permute.xlu0 %v1255_v5  ;;  %v507_v5 = vmul.f32 %v505_v39, %v1499_v10 }
 0x126   : > { %476 = vrot.lane.b32.xlu1 %v470_v35, %s1261_s8  ;;  %478 = vrot.lane.b32.xlu0 %v471_v36, %s1261_s8 }
 0x12a   : > { %480 = vrot.lane.b32.xlu1 %v472_v37, %s1261_s8 }
 0x173   : > { %v526_v40 = vpop.permute.xlu1 %525  ;;  %v524_v41 = vpop.permute.xlu0 %523 }
 0x174   : > { %v529_v0 = vsel %vm459_vm0, %v524_v41, %v526_v40 }
 0x175   : > { %v534_v12 = vadd.f32 %v529_v0, %v507_v5 }
 0x177   : > { %v528_v42 = vpop.permute.xlu0 %527 }
 0x178   : > { %v610_v43 = vpop.permute.xlu1 %609  ;;  %v530_v48 = vsel %vm459_vm0, %v526_v40, %v528_v42  ;;  %v536_v51 = vadd.f32 %v528_v42, %v509_v47 }
 0x179   : > { %v535_v52 = vadd.f32 %v530_v48, %v508_v50 }
 0x17b   : > { %v612_v44 = vpop.permute.xlu0 %611 }
 0x17c   : > { %v614_v45 = vpop.permute.xlu1 %613  ;;  %v615_v54 = vsel %vm459_vm0, %v610_v43, %v612_v44 }
 0x17d   : > { %v620_v61 = vadd.f32 %v615_v54, %v593_v58  ;;  %v622_v62 = vadd.f32 %v614_v45, %v595_v59  ;;  %v616_v1 = vsel %vm459_vm0, %v612_v44, %v614_v45 }
 0x17e   : > { %v621_v13 = vadd.f32 %v616_v1, %v594_v4 }
 0x17f   : > { %v548_v46 = vpop.permute.xlu0 %547 }
 0x180   : > { %v550_v49 = vpop.permute.xlu1 %549 }
 0x181   : > { %v553_v8 = vsel %vm482_vm1, %v548_v46, %v550_v49 }
 0x182   : > { %v558_v14 = vadd.f32 %v553_v8, %v534_v12 }
 0x183   : > { %v552_v53 = vpop.permute.xlu0 %551 }
 0x184   : > { %v554_v55 = vsel %vm482_vm1, %v550_v49, %v552_v53  ;;  %v560_v56 = vadd.f32 %v552_v53, %v536_v51  ;;  %v634_v57 = vpop.permute.xlu1 %633 }
 0x185   : > { %v559_v60 = vadd.f32 %v554_v55, %v535_v52 }
 0x186   : > { %572 = vrot.lane.b32.xlu0 %v560_v56, %s1262_s19 }
 0x187   : > { %v636_v63 = vpop.permute.xlu0 %635  ;;  %570 = vrot.lane.b32.xlu1 %v559_v60, %s1262_s19 }
 0x188   : > { %v639_v2 = vsel %vm482_vm1, %v634_v57, %v636_v63  ;;  %v638_v3 = vpop.permute.xlu1 %637 }
 0x189   : > { %v644_v6 = vadd.f32 %v639_v2, %v620_v61  ;;  %v646_v7 = vadd.f32 %v638_v3, %v622_v62  ;;  %v640_v9 = vsel %vm482_vm1, %v636_v63, %v638_v3 }
 0x18a   : > { %v645_v15 = vadd.f32 %v640_v9, %v621_v13 }
 0x18b   : > { %658 = vrot.lane.b32.xlu0 %v646_v7, %s1263_s18  ;;  %654 = vrot.lane.b32.xlu1 %v644_v6, %s1263_s18 }
 0x18f   : > { %568 = vrot.lane.b32.xlu0 %v558_v14, %s1262_s19  ;;  %656 = vrot.lane.b32.xlu1 %v645_v15, %s1263_s18 }
 0x193   : > { %719 = vperm.xlu0 %1067, %v1535_v29   ;;  %703 = vperm.xlu1 %1066, %v1535_v29  }
 0x198   : > { %v437_v16 = vpop.permute.xlu0 %436 }
 0x199   : > { %v672_v17 = vpop.permute.xlu1 %671  ;;  %v439_v20 = vmul.f32 %v437_v16, %v1499_v10  ;;  %v440_v24 = vmul.f32 %v437_v16, %v1503_v11  ;;  %v401_v10 = vlaneseq }
 0x19b   : > { %v402_v35 = vand.u32 127, %v401_v10  ;;  %v675_v49 = vshrl.u32 %v401_v10, 7 }
 0x19d   : > { %v454_v18 = vpop.permute.xlu1 %453  ;;  %v688_v19 = vpop.permute.xlu0 %687  ;;  %v403_v37 = vadd.s32 128, %v402_v35  ;;  %v408_v39 = vand.u32 15, %v402_v35  ;;  %v676_v57 = vsub.s32 0, %v675_v49  ;;  %v692_v58 = vsub.s32 1, %v675_v49 }
 0x19e   : > { %v708_v63 = vsub.s32 2, %v675_v49  ;;  %v724_v0 = vsub.s32 3, %v675_v49 }
 0x19f   : > { %v415_v11 = vand.u32 15, %v403_v37  ;;  %vm428_vm2 = vcmp.ge.s32.totalorder %v408_v39, 2  ;;  %vm585_vm6 = vcmp.lt.s32.totalorder %v408_v39, 14 }
 0x1a1   : > { %v456_v21 = vpop.permute.xlu1 %455  ;;  %v458_v22 = vpop.permute.xlu0 %457  ;;  %vm429_vm5 = vcmp.ge.s32.totalorder %v415_v11, 2  ;;  %vm586_vm7 = vcmp.lt.s32.totalorder %v415_v11, 14 }
 0x1a2   : > { %v460_v23 = vsel %vm459_vm0, %v454_v18, %v456_v21  ;;  %v461_v26 = vsel %vm459_vm0, %v456_v21, %v458_v22 }
 0x1a3   : > { %v464_v25 = vadd.f32 %v460_v23, %v439_v20  ;;  %v465_v29 = vadd.f32 %v461_v26, %v440_v24 }
 0x1a5   : > { %v477_v27 = vpop.permute.xlu1 %476  ;;  %v479_v28 = vpop.permute.xlu0 %478 }
 0x1a6   : > { %v483_v30 = vsel %vm482_vm1, %v477_v27, %v479_v28 }
 0x1a7   : > { %v487_v31 = vadd.f32 %v483_v30, %v464_v25 }
 0x1a9   : > { %v481_v32 = vpop.permute.xlu1 %480  ;;  %v493_v43 = vsel %vm428_vm2, %v487_v31, 0.0 }
 0x1aa   : > { %v484_v33 = vsel %vm482_vm1, %v479_v28, %v481_v32 }
 0x1ab   : > { %v488_v34 = vadd.f32 %v484_v33, %v465_v29 }
 0x1ad   : > { %v494_v51 = vsel %vm429_vm5, %v488_v34, 0.0 }
 0x1f8   : > { %v573_v36 = vpop.permute.xlu0 %572 }
 0x1f9   : > { %v571_v38 = vpop.permute.xlu1 %570 }
 0x1fa   : > { %v576_v45 = vsel %vm574_vm3, %v571_v38, %v573_v36 }
 0x1fb   : > { %v582_v54 = vadd.f32 %v576_v45, %v494_v51 }
 0x1fd   : > { %v659_v40 = vpop.permute.xlu0 %658  ;;  %v655_v41 = vpop.permute.xlu1 %654 }
 0x201   : > { %v569_v42 = vpop.permute.xlu0 %568  ;;  %v657_v44 = vpop.permute.xlu1 %656 }
 0x202   : > { %v575_v46 = vsel %vm574_vm3, %v569_v42, %v571_v38  ;;  %v661_v47 = vsel %vm660_vm4, %v655_v41, %v657_v44  ;;  %v662_v48 = vsel %vm660_vm4, %v657_v44, %v659_v40 }
 0x203   : > { %v581_v50 = vadd.f32 %v575_v46, %v493_v43  ;;  %v665_v52 = vsel %vm585_vm6, %v661_v47, 0.0  ;;  %v666_v53 = vsel %vm586_vm7, %v662_v48, 0.0 }
 0x204   : > { %v668_v56 = vadd.f32 %v666_v53, %v582_v54 }
 0x205   : > { %v667_v55 = vadd.f32 %v665_v52, %v581_v50 }
 0x206   : > { %v681_v60 = vrot.slane %v668_v56, %v676_v57  ;;  %v697_v62 = vrot.slane %v668_v56, %v692_v58  ;;  %v713_v6 = vrot.slane %v668_v56, %v708_v63  ;;  %v729_v9 = vrot.slane %v668_v56, %v724_v0 }
 0x207   : > { %v677_v59 = vrot.slane %v667_v55, %v676_v57  ;;  %v693_v61 = vrot.slane %v667_v55, %v692_v58  ;;  %v709_v5 = vrot.slane %v667_v55, %v708_v63  ;;  %v725_v8 = vrot.slane %v667_v55, %v724_v0 }
 0x208   : > { %v683_v2 = vmul.f32 %v681_v60, %v672_v17  ;;  %v699_v4 = vmul.f32 %v697_v62, %v688_v19 }
 0x209   : > { %v682_v1 = vmul.f32 %v677_v59, %v672_v17  ;;  %v698_v3 = vmul.f32 %v693_v61, %v688_v19 }
 0x20a   : > { %v701_v14 = vadd.f32 %v699_v4, %v683_v2 }
 0x20b   : > { %v700_v13 = vadd.f32 %v698_v3, %v682_v1 }
 0x212   : > { %v720_v7 = vpop.permute.xlu0 %719  ;;  %v704_v12 = vpop.permute.xlu1 %703 }
 0x213   : > { %v714_v15 = vmul.f32 %v709_v5, %v704_v12  ;;  %v715_v16 = vmul.f32 %v713_v6, %v704_v12  ;;  %v730_v18 = vmul.f32 %v725_v8, %v720_v7  ;;  %v731_v20 = vmul.f32 %v729_v9, %v720_v7 }
 0x215   : > { %v716_v21 = vadd.f32 %v714_v15, %v700_v13  ;;  %v717_v22 = vadd.f32 %v715_v16, %v701_v14 }
 0x217   : > { %v732_v17 = vadd.f32 %v730_v18, %v716_v21  ;;  %v733_v23 = vadd.f32 %v731_v20, %v717_v22 }
 0x219   : > { %v736_v19 = vadd.f32 %v733_v23, %v732_v17  ;;  %v739_v24 = vmul.f32 %v732_v17, %v732_v17  ;;  %v740_v25 = vmul.f32 %v733_v23, %v733_v23  ;;  %734 = vst [vmem:[%s379_s17] sm:$0xff] %v732_v17  ;;  %735 = vst [vmem:[%s379_s17 + $0x8] sm:$0xff] %v733_v23 }
 0x21b   : > { %737 = vadd.xlane.f32.xlu1 %v736_v19  ;;  %v741_v26 = vadd.f32 %v740_v25, %v739_v24 }
 0x21d   : > { %742 = vadd.xlane.f32.xlu0 %v741_v26 }
 0x21e   : > { %1173 = shalt.err (!%p1170_p10)
}
 0x21f   : > { %s1174_s0 = scalar_lea.hbm %s1579_s20, 256  ;;  %s1178_s26 = scalar_lea.hbm %s1632_s5, 512 }
 0x220   : > { %p1175_p11 = scmp.ne.s32.totalorder %s1579_s20, %s1174_s0  ;;  %p1179_p4 = scmp.lt.u32.totalorder %s1579_s20, %s1632_s5 }
 0x221   : > { %p1180_p5 = scmp.lt.u32.totalorder %s1178_s26, %s1174_s0  ;;  %p1182_p13 = scmp.lt.u32.totalorder %s1174_s0, %s1579_s20 }
 0x222   : > { %p1176_p0 = pnand %p1175_p11, %p1670_p6 }
 0x223   : > { %p1181_p3 = por %p1180_p5, %p1179_p4 }
 0x224   : > { %p1177_p2 = pneg %p1176_p0 }
 0x225   : > { %p1183_p7 = por %p1182_p13, %p1181_p3 }
 0x227   : > { %p1184_p12 = pnand %p1183_p7, %p1177_p2 }
 0x229   : > { %1187 = shalt.err (!%p1184_p12)
}
 0x22a   : > { %976 = dma.vmem_to_hbm [thread:$0]  (%p1670_p6), %s786_s14, 256, %s1579_s20, %s765_s21   ;;  %vm748_vm8 = vcmask 7168   ;;  %vm750_vm9 = vcmask 15368  }
 0x22b   : > { %p392_p1 = scmp.lt.s32.totalorder %s1238_s24, 1 }
 0x22d   : > { %s1686_s24 = smov (!%p392_p1, %s1238_s24), 1 }
 0x22e   : > { %s962_s8 = sshll.u32 %s1686_s24, 3 }
 0x22f   : > { %s395_s19 = scalar_lea.vmem %s1633_s6, %s962_s8 }
 0x2a8   : > { %v738_v27 = vpop.xlane.xlu1 %737 }
 0x2a9   : > { %749 = vst.msk [vmem:[%s395_s19] sm:$0xff] %vm748_vm8, %v738_v27 }
 0x2aa   : > { %v743_v28 = vpop.xlane.xlu0 %742 }
 0x2ab   : > { %751 = vst.msk [vmem:[%s395_s19] sm:$0xff] %vm750_vm9, %v743_v28 }
 0x2ac PF: > { %s1671_s18 = sld [smem:[#allocation12_spill]]  ;;  %s1672_s10 = sld [smem:[#allocation18_spill]] }
 0x2ad   : > { %s1673_s23 = sld [smem:[#allocation15_spill]] }
 0x2b2   : > { %s800_s17 = sand.u32 1, %s1671_s18   ;;  %p1674_p8 = scmp.ne.s32.totalorder %s1672_s10, 0 }
 0x2b3   : > { %p1675_p6 = scmp.ge.s32.totalorder %s1673_s23, 2  ;;  %s801_s1 = scalar_lea.sflag [#allocation4], %s800_s17 }
 0x2b5   : > { %p989_p9 = pnand %p1675_p6, %p1674_p8 }
 0x2b7   : > { %1221 = dma.done.wait (!%p989_p9), %s801_s1, 256  }
 0x2b8   : > { %1223 = vsyncadd (!%p989_p9), %s801_s1, 4294967040  ;;  %s26_s26 = sadd.s32 1, %s1673_s23   ;;  %s1676_s24 = sld [smem:[#allocation13_spill]] }
 0x2b9   : > { %p23_p10 = scmp.ge.s32.totalorder %s26_s26, 4   ;;  %s1677_s23 = sld [smem:[#allocation17_spill]] }
 0x2ba   : > { %s1678_s14 = sld [smem:[#allocation14_spill]]  ;;  %s1679_s25 = sld [smem:[#allocation16_spill]] }
 0x2bb   : > { %s1680_s21 = smov %s1230_s22  ;;  %25 = sbr.rel (!%p23_p10) target bundleno = 11 (0xb), region = 129 }
 0x2be   : > { %s1681_s22 = smov %s1676_s24 }
 0x2c0   : > { %s1682_s24 = smov %s1678_s14 }
 0x2c2   :  { %813 = vsyncpa [#allocation3], 1 }
 0x2c3   :  { %815 = vsyncpa [#allocation3 + $0x1], 1 }
 0x2c4   :  { %816 = vsyncpa [#allocation6], 1 }
 0x2c5   :  { %818 = vsyncpa [#allocation6 + $0x1], 1 }
 0x2c6   :  { %819 = vsyncpa [#allocation4], 1 }
 0x2c7   :  { %821 = vsyncpa [#allocation4 + $0x1], 1 }

</bundles_post_ra>
